<compile_context>
chip_gen: v7x
topology: tpu7x:2x2x1
jax: 0.10.0
libtpu: 0.0.40
codegen_flags: <defaults>
</compile_context>

<pallas_src>
import functools

import jax
import jax.numpy as jnp
from jax import lax
from jax.experimental import pallas as pl
from jax.experimental.pallas import tpu as pltpu

_SUBLANE = 8


def _cdiv(a, b):
    return -(-a // b)


def _round_up(x, m):
    return _cdiv(x, m) * m


def _bce_with_logits(x, y):
    # Numerically stable elementwise BCE-with-logits (matches PyTorch):
    #   max(x, 0) - x*y + log(1 + exp(-|x|))
    return jnp.maximum(x, 0.0) - x * y + jnp.log1p(jnp.exp(-jnp.abs(x)))


def _bce_way2_kernel(logit_ref, target_ref, frame_ref, out_ref, fmax_ref, *,
                     w0, w1, b_true, c_true, t_true, tb, tc, tt, neg,
                     ragged_t):
    # Grid queries at kernel top level only (never inside pl.when bodies).
    b = pl.program_id(0)
    c = pl.program_id(1)
    t = pl.program_id(2)
    nt = pl.num_programs(2)

    @pl.when(t == 0)
    def _init():
        fmax_ref[...] = jnp.full(fmax_ref.shape, neg, dtype=fmax_ref.dtype)

    # Running max over the time tile, kept in the input dtype (max is exact).
    frame = frame_ref[...]                             # (TB, TT, TC)
    if ragged_t:
        # Mask the undefined tail of the last (ragged) time tile so it can't
        # contaminate the max.  (1-col iota broadcasts over batch & class.)
        t_idx = lax.broadcasted_iota(jnp.int32, (tt, 1), 0) + t * tt
        frame = jnp.where(t_idx < t_true, frame, jnp.asarray(neg, frame.dtype))
    fmax_ref[...] = jnp.maximum(fmax_ref[...], jnp.max(frame, axis=1))

    @pl.when(t == nt - 1)
    def _finalize():
        x = logit_ref[...].astype(jnp.float32)         # (TB, TC)
        y = target_ref[...].astype(jnp.float32)        # (TB, TC)
        m = fmax_ref[...].astype(jnp.float32)          # (TB, TC)

        shape = x.shape
        row = lax.broadcasted_iota(jnp.int32, shape, 0) + b * tb
        col = lax.broadcasted_iota(jnp.int32, shape, 1) + c * tc
        valid = (row < b_true) & (col < c_true)

        bce_main = jnp.where(valid, _bce_with_logits(x, y), 0.0)
        bce_aux = jnp.where(valid, _bce_with_logits(m, y), 0.0)

        inv_n = 1.0 / float(b_true * c_true)
        partial = (w0 * jnp.sum(bce_main) + w1 * jnp.sum(bce_aux)) * inv_n
        out_ref[...] = jnp.full(out_ref.shape, partial, dtype=out_ref.dtype)


def bce_way2_loss(logit, framewise_logit, target, weights=(1.0, 1.0)):
    """Pallas implementation of BCEWay2Loss.forward.

    Args:
      logit:            (B, C) float logits (clipwise head).
      framewise_logit:  (B, T, C) float logits (framewise head).
      target:           (B, C) targets (cast to float32 in-kernel).
      weights:          (w0, w1) loss weights.
    Returns:
      scalar float32 loss.
    """
    B, C = logit.shape
    Bf, T, Cf = framewise_logit.shape
    if (Bf, Cf) != (B, C):
        raise ValueError(f"framewise_logit shape {framewise_logit.shape} does "
                         f"not match logit shape {logit.shape}")
    if tuple(target.shape) != (B, C):
        raise ValueError(f"target shape {target.shape} != {(B, C)}")

    w0, w1 = float(weights[0]), float(weights[1])

    # Only non-float targets (bool/int) are converted up front; float targets
    # stream in their native dtype and are cast to f32 in finalize.
    if not jnp.issubdtype(target.dtype, jnp.floating):
        target = target.astype(jnp.float32)

    frame_dtype = framewise_logit.dtype
    itemsize = jnp.dtype(frame_dtype).itemsize
    neg = float(jnp.finfo(frame_dtype).min)   # finite -inf-like pad for max

    # ---- tiling (no wrapper-side padding; ragged tiles masked in-kernel) --
    # Class tile: full C when small, otherwise 512-lane tiles (multiple of 128
    # so the ragged tail block is legal); gives v7x a second parallel axis.
    TC = C if C <= 512 else 512
    nc = _cdiv(C, TC)

    # Balanced batch tile: <= 64 rows, waste per tile capped at 7 rows.
    nb_target = _cdiv(B, 64)
    TB = _round_up(_cdiv(B, nb_target), _SUBLANE)
    nb = _cdiv(B, TB)

    # Time tile from a 12 MiB-per-buffer budget (2 frame buffers stay well
    # under v7x's 64 MiB VMEM); multiple of 16 covers f32 and bf16 packing.
    per_step_bytes = TB * TC * itemsize
    budget_per_buffer = 12 * 1024 * 1024
    tt_cap = max(16, (budget_per_buffer // per_step_bytes) // 16 * 16)
    TT = int(min(tt_cap, _round_up(T, 16)))
    nt = _cdiv(T, TT)
    ragged_t = (T % TT) != 0

    # VMEM limit derived from actual buffer sizes (double-buffered inputs and
    # output, plus the running-max scratch) with headroom.
    frame_blk = TB * TT * TC * itemsize
    logit_blk = TB * TC * jnp.dtype(logit.dtype).itemsize
    target_blk = TB * TC * jnp.dtype(target.dtype).itemsize
    out_blk = 8 * 128 * 4
    scratch_bytes = TB * TC * itemsize
    vmem_bytes = 2 * (frame_blk + logit_blk + target_blk + out_blk) + scratch_bytes
    vmem_limit = int(min(56 * 1024 * 1024,
                         max(32 * 1024 * 1024, int(vmem_bytes * 1.5))))

    kernel = functools.partial(
        _bce_way2_kernel, w0=w0, w1=w1, b_true=B, c_true=C, t_true=T,
        tb=TB, tc=TC, tt=TT, neg=neg, ragged_t=ragged_t)

    # Per-(B,C)-tile partial losses, one lane-dense (8, 128) slab each.
    out = pl.pallas_call(
        kernel,
        out_shape=jax.ShapeDtypeStruct((nb, nc, 8, 128), jnp.float32),
        grid=(nb, nc, nt),
        in_specs=[
            pl.BlockSpec((TB, TC), lambda b, c, t: (b, c)),          # logit
            pl.BlockSpec((TB, TC), lambda b, c, t: (b, c)),          # target
            pl.BlockSpec((TB, TT, TC), lambda b, c, t: (b, t, c)),   # framewise
        ],
        out_specs=pl.BlockSpec((1, 1, 8, 128), lambda b, c, t: (b, c, 0, 0)),
        scratch_shapes=[pltpu.VMEM((TB, TC), frame_dtype)],          # running max
        compiler_params=pltpu.CompilerParams(
            dimension_semantics=("parallel", "parallel", "arbitrary"),
            vmem_limit_bytes=vmem_limit,
        ),
    )(logit, target, framewise_logit)

    # Partials are already weighted and scaled by 1/(B*C); sum over tiles.
    return jnp.sum(out[:, :, 0, 0])


def _reference(logit, framewise_logit, target, weights=(1.0, 1.0)):
    target = target.astype(jnp.float32)
    fmax = jnp.max(framewise_logit.astype(jnp.float32), axis=1)
    loss = jnp.mean(_bce_with_logits(logit.astype(jnp.float32), target))
    aux = jnp.mean(_bce_with_logits(fmax, target))
    return weights[0] * loss + weights[1] * aux


if __name__ == "__main__":
    key = jax.random.PRNGKey(0)
    k1, k2, k3 = jax.random.split(key, 3)

    B, T, C = 2, 8, 16  # small shapes: batch=2, frames=8, classes=16
    logit = jax.random.normal(k1, (B, C), dtype=jnp.float32)
    framewise_logit = jax.random.normal(k2, (B, T, C), dtype=jnp.float32)
    target = jax.random.bernoulli(k3, 0.3, (B, C)).astype(jnp.float32)

    out = bce_way2_loss(logit, framewise_logit, target, weights=(1.0, 1.0))
    out = jax.block_until_ready(out)

    ref = _reference(logit, framewise_logit, target, weights=(1.0, 1.0))
    assert jnp.allclose(out, ref, rtol=1e-5, atol=1e-5), (out, ref)

    print("KERNEL_OK")
</pallas_src>

<mosaic_0001>
module attributes {stable_mosaic.version = 11 : i64} {
  func.func @_bce_way2_kernel(%arg0: i32, %arg1: i32, %arg2: i32, %arg3: memref<8x16xf32, #tpu.memory_space<vmem>>, %arg4: memref<8x16xf32, #tpu.memory_space<vmem>>, %arg5: memref<8x16x16xf32, #tpu.memory_space<vmem>>, %arg6: memref<1x1x8x128xf32, #tpu.memory_space<vmem>>, %arg7: memref<8x16xf32, #tpu.memory_space<vmem>>) attributes {dimension_semantics = [#tpu.dimension_semantics<parallel>, #tpu.dimension_semantics<parallel>, #tpu.dimension_semantics<arbitrary>], iteration_bounds = array<i64: 1, 1, 1>, scalar_prefetch = 0 : i64, scratch_operands = 1 : i64, tpu.core_type = #tpu.core_type<tc>, window_params = [{transform_indices = @transform_0, window_bounds = array<i64: 8, 16>}, {transform_indices = @transform_1, window_bounds = array<i64: 8, 16>}, {transform_indices = @transform_2, window_bounds = array<i64: 8, 16, 16>}, {transform_indices = @transform_3, window_bounds = array<i64: 1, 1, 8, 128>}]} {
    %c0_i32 = arith.constant 0 : i32
    %0 = arith.cmpi eq, %arg2, %c0_i32 : i32
    %1 = arith.extui %0 : i1 to i32
    %c0_i32_0 = arith.constant 0 : i32
    %2 = arith.cmpi ne, %1, %c0_i32_0 : i32
    scf.if %2 {
      %cst_10 = arith.constant -3.40282347E+38 : f32
      %21 = vector.broadcast %cst_10 : f32 to vector<8x16xf32>
      %c0_11 = arith.constant 0 : index
      %c0_12 = arith.constant 0 : index
      %22 = vector.load %arg7[%c0_11, %c0_12] : memref<8x16xf32, #tpu.memory_space<vmem>>, vector<8x16xf32>
      tpu.vector_store %arg7[%c0_11, %c0_12], %21 {strides = array<i32>} : memref<8x16xf32, #tpu.memory_space<vmem>>, vector<8x16xf32>,
    } else {
    }
    %c0 = arith.constant 0 : index
    %c0_1 = arith.constant 0 : index
    %c0_2 = arith.constant 0 : index
    %3 = vector.load %arg5[%c0, %c0_1, %c0_2] : memref<8x16x16xf32, #tpu.memory_space<vmem>>, vector<8x16x16xf32>
    %4 = tpu.iota {dimensions = array<i32: 0>} : vector<16x1xi32>
    %c16_i32 = arith.constant 16 : i32
    %5 = arith.muli %arg2, %c16_i32 : i32
    %6 = vector.broadcast %5 : i32 to vector<16x1xi32>
    %7 = arith.addi %4, %6 : vector<16x1xi32>
    %c8_i32 = arith.constant 8 : i32
    %8 = vector.broadcast %c8_i32 : i32 to vector<16x1xi32>
    %9 = arith.cmpi slt, %7, %8 : vector<16x1xi32>
    %cst = arith.constant -3.40282347E+38 : f32
    %10 = vector.shape_cast %9 : vector<16x1xi1> to vector<1x16x1xi1>
    %11 = vector.broadcast %10 : vector<1x16x1xi1> to vector<8x16x16xi1>
    %12 = vector.broadcast %cst : f32 to vector<8x16x16xf32>
    %13 = arith.select %11, %3, %12 : vector<8x16x16xi1>, vector<8x16x16xf32>
    %c0_3 = arith.constant 0 : index
    %c0_4 = arith.constant 0 : index
    %14 = vector.load %arg7[%c0_3, %c0_4] : memref<8x16xf32, #tpu.memory_space<vmem>>, vector<8x16xf32>
    %cst_5 = arith.constant dense<0xFF800000> : vector<8x16xf32>
    %15 = vector.multi_reduction <maximumf>, %13, %cst_5 [1] : vector<8x16x16xf32> to vector<8x16xf32>
    %16 = arith.maximumf %14, %15 : vector<8x16xf32>
    %c0_6 = arith.constant 0 : index
    %c0_7 = arith.constant 0 : index
    %17 = vector.load %arg7[%c0_6, %c0_7] : memref<8x16xf32, #tpu.memory_space<vmem>>, vector<8x16xf32>
    tpu.vector_store %arg7[%c0_6, %c0_7], %16 {strides = array<i32>} : memref<8x16xf32, #tpu.memory_space<vmem>>, vector<8x16xf32>,
    %c0_i32_8 = arith.constant 0 : i32
    %18 = arith.cmpi eq, %arg2, %c0_i32_8 : i32
    %19 = arith.extui %18 : i1 to i32
    %c0_i32_9 = arith.constant 0 : i32
    %20 = arith.cmpi ne, %19, %c0_i32_9 : i32
    scf.if %20 {
      %c0_10 = arith.constant 0 : index
      %c0_11 = arith.constant 0 : index
      %21 = vector.load %arg3[%c0_10, %c0_11] : memref<8x16xf32, #tpu.memory_space<vmem>>, vector<8x16xf32>
      %c0_12 = arith.constant 0 : index
      %c0_13 = arith.constant 0 : index
      %22 = vector.load %arg4[%c0_12, %c0_13] : memref<8x16xf32, #tpu.memory_space<vmem>>, vector<8x16xf32>
      %c0_14 = arith.constant 0 : index
      %c0_15 = arith.constant 0 : index
      %23 = vector.load %arg7[%c0_14, %c0_15] : memref<8x16xf32, #tpu.memory_space<vmem>>, vector<8x16xf32>
      %24 = tpu.iota {dimensions = array<i32: 0>} : vector<8x16xi32>
      %c8_i32_16 = arith.constant 8 : i32
      %25 = arith.muli %arg0, %c8_i32_16 : i32
      %26 = vector.broadcast %25 : i32 to vector<8x16xi32>
      %27 = arith.addi %24, %26 : vector<8x16xi32>
      %28 = tpu.iota {dimensions = array<i32: 1>} : vector<8x16xi32>
      %c16_i32_17 = arith.constant 16 : i32
      %29 = arith.muli %arg1, %c16_i32_17 : i32
      %30 = vector.broadcast %29 : i32 to vector<8x16xi32>
      %31 = arith.addi %28, %30 : vector<8x16xi32>
      %c2_i32 = arith.constant 2 : i32
      %32 = vector.broadcast %c2_i32 : i32 to vector<8x16xi32>
      %33 = arith.cmpi slt, %27, %32 : vector<8x16xi32>
      %c16_i32_18 = arith.constant 16 : i32
      %34 = vector.broadcast %c16_i32_18 : i32 to vector<8x16xi32>
      %35 = arith.cmpi slt, %31, %34 : vector<8x16xi32>
      %36 = arith.andi %33, %35 : vector<8x16xi1>
      %cst_19 = arith.constant 0.000000e+00 : f32
      %37 = vector.broadcast %cst_19 : f32 to vector<8x16xf32>
      %38 = arith.maximumf %21, %37 : vector<8x16xf32>
      %39 = arith.mulf %21, %22 : vector<8x16xf32>
      %40 = arith.subf %38, %39 : vector<8x16xf32>
      %41 = math.absf %21 : vector<8x16xf32>
      %cst_20 = arith.constant 0.000000e+00 : f32
      %42 = vector.broadcast %cst_20 : f32 to vector<8x16xf32>
      %43 = arith.subf %42, %41 : vector<8x16xf32>
      %44 = math.exp %43 : vector<8x16xf32>
      %45 = math.log1p %44 : vector<8x16xf32>
      %46 = arith.addf %40, %45 : vector<8x16xf32>
      %cst_21 = arith.constant 0.000000e+00 : f32
      %47 = vector.broadcast %cst_21 : f32 to vector<8x16xf32>
      %48 = arith.select %36, %46, %47 : vector<8x16xi1>, vector<8x16xf32>
      %cst_22 = arith.constant 0.000000e+00 : f32
      %49 = vector.broadcast %cst_22 : f32 to vector<8x16xf32>
      %50 = arith.maximumf %23, %49 : vector<8x16xf32>
      %51 = arith.mulf %23, %22 : vector<8x16xf32>
      %52 = arith.subf %50, %51 : vector<8x16xf32>
      %53 = math.absf %23 : vector<8x16xf32>
      %cst_23 = arith.constant 0.000000e+00 : f32
      %54 = vector.broadcast %cst_23 : f32 to vector<8x16xf32>
      %55 = arith.subf %54, %53 : vector<8x16xf32>
      %56 = math.exp %55 : vector<8x16xf32>
      %57 = math.log1p %56 : vector<8x16xf32>
      %58 = arith.addf %52, %57 : vector<8x16xf32>
      %cst_24 = arith.constant 0.000000e+00 : f32
      %59 = vector.broadcast %cst_24 : f32 to vector<8x16xf32>
      %60 = arith.select %36, %58, %59 : vector<8x16xi1>, vector<8x16xf32>
      %61 = vector.shape_cast %48 : vector<8x16xf32> to vector<1x8x16xf32>
      %cst_25 = arith.constant dense<0.000000e+00> : vector<1xf32>
      %62 = vector.multi_reduction <add>, %61, %cst_25 [1, 2] : vector<1x8x16xf32> to vector<1xf32>
      %63 = vector.shape_cast %62 : vector<1xf32> to vector<1x1x1xf32>
      %64 = vector.extract %63[0, 0, 0] : f32 from vector<1x1x1xf32>
      %cst_26 = arith.constant 1.000000e+00 : f32
      %65 = arith.mulf %cst_26, %64 : f32
      %66 = vector.shape_cast %60 : vector<8x16xf32> to vector<1x8x16xf32>
      %cst_27 = arith.constant dense<0.000000e+00> : vector<1xf32>
      %67 = vector.multi_reduction <add>, %66, %cst_27 [1, 2] : vector<1x8x16xf32> to vector<1xf32>
      %68 = vector.shape_cast %67 : vector<1xf32> to vector<1x1x1xf32>
      %69 = vector.extract %68[0, 0, 0] : f32 from vector<1x1x1xf32>
      %cst_28 = arith.constant 1.000000e+00 : f32
      %70 = arith.mulf %cst_28, %69 : f32
      %71 = arith.addf %65, %70 : f32
      %cst_29 = arith.constant 3.125000e-02 : f32
      %72 = arith.mulf %71, %cst_29 : f32
      %73 = vector.broadcast %72 : f32 to vector<1x1x8x128xf32>
      %c0_30 = arith.constant 0 : index
      %c0_31 = arith.constant 0 : index
      %c0_32 = arith.constant 0 : index
      %c0_33 = arith.constant 0 : index
      %74 = vector.load %arg6[%c0_30, %c0_31, %c0_32, %c0_33] : memref<1x1x8x128xf32, #tpu.memory_space<vmem>>, vector<1x1x8x128xf32>
      tpu.vector_store %arg6[%c0_30, %c0_31, %c0_32, %c0_33], %73 {strides = array<i32>} : memref<1x1x8x128xf32, #tpu.memory_space<vmem>>, vector<1x1x8x128xf32>,
    } else {
    }
    return
  }
  func.func @transform_0(%arg0: i32, %arg1: i32, %arg2: i32) -> (i32, i32) {
    %c0_i32 = arith.constant 0 : i32
    return %arg0, %arg1 : i32, i32
  }
  func.func @transform_1(%arg0: i32, %arg1: i32, %arg2: i32) -> (i32, i32) {
    %c0_i32 = arith.constant 0 : i32
    return %arg0, %arg1 : i32, i32
  }
  func.func @transform_2(%arg0: i32, %arg1: i32, %arg2: i32) -> (i32, i32, i32) {
    %c0_i32 = arith.constant 0 : i32
    return %arg0, %arg2, %arg1 : i32, i32, i32
  }
  func.func @transform_3(%arg0: i32, %arg1: i32, %arg2: i32) -> (i32, i32, i32, i32) {
    %c0_i32 = arith.constant 0 : i32
    %c0_i32_0 = arith.constant 0 : i32
    %c0_i32_1 = arith.constant 0 : i32
    return %arg0, %arg1, %c0_i32, %c0_i32_0 : i32, i32, i32, i32
  }
}

</mosaic_0001>

<bundles_post_ra>
// kernel: tpu_custom_call.1
= control target key start
LH: loop header
LB: loop body
LE: loop exit
PB: predicated region body
PF: predicated region fallthrough
CT: control target
= control target key end

     0   :  { %8 = vsyncpa [#allocation4], 0  ;;  %s479_s0 = inlined_call_operand.hbm [shape: f32[2,16], index: 0, kind: input, shape index: {}]   ;;  %s480_s1 = inlined_call_operand.vmem [shape: f32[2,16], index: 1, kind: input, shape index: {}]   ;;  %s481_s2 = inlined_call_operand.hbm [shape: f32[2,8,16], index: 2, kind: input, shape index: {}]   ;;  %s482_s3 = inlined_call_operand.hbm [shape: f32[1,1,8,128], index: 3, kind: output, shape index: {}]  }
   0x1   :  { %9 = vsyncpa [#allocation7], 0 }
   0x2   :  { %10 = vsyncpa [#allocation5], 0 }
   0x3   :  { %15 = vsyncadd [#allocation4], 96  ;;  %s388_s12 = smov [#allocation3]   ;;  %s338_s16 = scalar_lea.hbm %s479_s0, 32 }
   0x4   :  { %s16_s13 = sshll.u32 %s388_s12, 4  ;;  %p339_p0 = scmp.ne.s32.totalorder %s479_s0, %s338_s16  ;;  %s17_s13 = int_to_ptr.vmem [resolvable:$true] %s16_s13 }
   0x5   :  { %p342_p1 = scmp.lt.u32.totalorder %s338_s16, %s479_s0 }
   0x7   :  { %p344_p2 = pnand %p342_p1, %p339_p0 }
   0x9   :  { %347 = shalt.err (!%p344_p2)
}
   0xa   :  { %s348_s21 = scalar_lea.vmem %s17_s13, 32  ;;  %s352_s22 = scalar_lea.vmem %s17_s13, 128 }
   0xb   :  { %p349_p3 = scmp.ne.s32.totalorder %s17_s13, %s348_s21  ;;  %p353_p4 = scmp.lt.s32.totalorder %s17_s13, %s17_s13 }
   0xc   :  { %p354_p5 = scmp.lt.s32.totalorder %s352_s22, %s348_s21 }
   0xe   :  { %p355_p6 = por %p354_p5, %p353_p4 }
  0x10   :  { %p356_p7 = pnand %p355_p6, %p349_p3 }
  0x12   :  { %359 = shalt.err (!%p356_p7)
}
  0x13   :  { %s389_s23 = smov 32   ;;  %s390_s24 = smov 2  }
  0x14   :  { %22 = dma.hbm_to_vmem [thread:$0]  %s479_s0, 32, %s17_s13, [#allocation4], %s389_s23, %s389_s23, %s390_s24  }
  0x15   :  { %29 = vsyncadd [#allocation7], 1792  ;;  %s34_s27 = sld [smem:[#allocation0]]   ;;  %s391_s28 = smov [#allocation6]  }
  0x16   :  { %s42_s29 = sshll.u32 %s391_s28, 4  ;;  %s392_s30 = smov 128   ;;  %s43_s29 = int_to_ptr.vmem [resolvable:$true] %s42_s29 }
  0x17   :  { %49 = sst [smem:[#allocation10]] %s392_s30  ;;  %s393_s4 = smov 256  }
  0x18   :  { %51 = sst [smem:[#allocation10 + $0x1]] %s393_s4  ;;  %s394_s5 = smov 1  }
  0x19   :  { %53 = sst [smem:[#allocation10 + $0x2]] %s394_s5  ;;  %s395_s8 = smov 8  }
  0x1a   :  { %55 = sst [smem:[#allocation10 + $0x3]] %s392_s30  ;;  %s396_s9 = smov [#allocation7]  }
  0x1b   :  { %s311_s6 = sshll.u32 %s34_s27, 26  ;;  %57 = sst [smem:[#allocation10 + $0x4]] %s392_s30 }
  0x1c   :  { %s312_s7 = sadd.s32 134217728, %s311_s6  ;;  %59 = sst [smem:[#allocation10 + $0x5]] %s395_s8 }
  0x1d   :  { %s397_s10 = smov [#allocation9]  }
  0x1e   :  { %61 = dma.general %s481_s2, 256, %s43_s29, %s396_s9, %s397_s10, [#allocation10], %s312_s7, 0  }
  0x1f   :  { %382 = dma.done.wait [#allocation4], 128  }
  0x20   :  { %383 = vsyncadd [#allocation4], 4294967168 }
  0x21   :  { %384 = dma.done.wait [#allocation7], 2048  }
  0x22   :  { %385 = vsyncadd [#allocation7], 4294965248  ;;  %vm72_vm0 = vcmask 130048   ;;  %v398_v0 = vmov -3.4028235e+38   ;;  %v437_v1 = vld [vmem:[#allocation3] sm:$0xff] }
  0x23   :  { %73 = vst.msk [vmem:[#allocation2] sm:$0xff] %vm72_vm0, %v398_v0  ;;  %v74_v2 = vld [vmem:[#allocation6] sm:$0xff]  ;;  %v399_v3 = vmov -inf   ;;  %v238_v5 = vand.u32 2147483647, %v437_v1  ;;  %v76_v6 = vld [vmem:[#allocation6 + $0x10] sm:$0xff] }
  0x24   :  { %v122_v4 = vsel %vm72_vm0, -3.4028235e+38, %v399_v3  ;;  %v78_v7 = vld [vmem:[#allocation6 + $0x20] sm:$0xff]  ;;  %v80_v8 = vld [vmem:[#allocation6 + $0x30] sm:$0xff]  ;;  %v121_v11 = vsel %vm72_vm0, %v74_v2, -inf  ;;  %v130_v12 = vsel %vm72_vm0, %v76_v6, -inf }
  0x25   :  { %v82_v9 = vld [vmem:[#allocation6 + $0x40] sm:$0xff]  ;;  %v84_v10 = vld [vmem:[#allocation6 + $0x50] sm:$0xff]  ;;  %v139_v13 = vsel %vm72_vm0, %v78_v7, -inf  ;;  %v239_v14 = vsub.f32 0.0, %v238_v5  ;;  %v123_v16 = vmax.f32 %v121_v11, %v122_v4  ;;  %v132_v17 = vmax.f32 %v130_v12, %v122_v4  ;;  %s400_s15 = smov [#allocation8]  }
  0x26   :  { %v86_v15 = vld [vmem:[#allocation6 + $0x60] sm:$0xff]  ;;  %v141_v18 = vmax.f32 %v139_v13, %v122_v4  ;;  %v148_v19 = vsel %vm72_vm0, %v80_v8, -inf  ;;  %v157_v20 = vsel %vm72_vm0, %v82_v9, -inf  ;;  %v166_v21 = vsel %vm72_vm0, %v84_v10, -inf  ;;  %v88_v26 = vld [vmem:[#allocation6 + $0x70] sm:$0xff]  ;;  %s301_s16 = sshll.u32 %s400_s15, 4  ;;  %s302_s16 = int_to_ptr.vmem [resolvable:$true] %s301_s16 }
  0x27   :  { %v240_v22 = vmul.f32 1.442695, %v239_v14  ;;  %v124_v23 = vrot.slane %v123_v16, 4  ;;  %v133_v24 = vrot.slane %v132_v17, 4  ;;  %v150_v25 = vmax.f32 %v148_v19, %v122_v4  ;;  %s360_s18 = scalar_lea.vmem %s302_s16, 128  ;;  %p365_p9 = scmp.lt.s32.totalorder %s302_s16, %s302_s16 }
  0x28   :  { %v142_v27 = vrot.slane %v141_v18, 4  ;;  %v159_v28 = vmax.f32 %v157_v20, %v122_v4  ;;  %v168_v29 = vmax.f32 %v166_v21, %v122_v4  ;;  %v175_v30 = vsel %vm72_vm0, %v86_v15, -inf  ;;  %p361_p8 = scmp.ne.s32.totalorder %s302_s16, %s360_s18  ;;  %p366_p10 = scmp.lt.s32.totalorder %s360_s18, %s360_s18 }
  0x29   :  { %vm201_vm1 = vcmask 1041409   ;;  %330 = vpow2.f32 %v240_v22  ;;  %v125_v31 = vmax.f32 %v123_v16, %v124_v23  ;;  %v134_v32 = vmax.f32 %v132_v17, %v133_v24  ;;  %v222_v24 = vld [vmem:[%s480_s1] sm:$0xff] }
  0x2a   :  { %v151_v33 = vrot.slane %v150_v25, 4  ;;  %v143_v34 = vmax.f32 %v141_v18, %v142_v27  ;;  %v160_v35 = vrot.slane %v159_v28, 4  ;;  %v169_v36 = vrot.slane %v168_v29, 4  ;;  %p367_p11 = por %p366_p10, %p365_p9 }
  0x2b   :  { %v177_v37 = vmax.f32 %v175_v30, %v122_v4  ;;  %vm203_vm2 = vcmask 1042434   ;;  %v126_v38 = vrot.slane %v125_v31, 2  ;;  %v135_v39 = vrot.slane %v134_v32, 2 }
  0x2c   :  { %v152_v40 = vmax.f32 %v150_v25, %v151_v33  ;;  %v184_v41 = vsel %vm72_vm0, %v88_v26, -inf  ;;  %v144_v42 = vrot.slane %v143_v34, 2  ;;  %v161_v43 = vmax.f32 %v159_v28, %v160_v35  ;;  %v119_v25 = vld [vmem:[#allocation2] sm:$0xff]  ;;  %p368_p12 = pnand %p367_p11, %p361_p8 }
  0x2d   :  { %v170_v44 = vmax.f32 %v168_v29, %v169_v36  ;;  %v178_v45 = vrot.slane %v177_v37, 4  ;;  %v127_v46 = vmax.f32 %v125_v31, %v126_v38  ;;  %v136_v47 = vmax.f32 %v134_v32, %v135_v39 }
  0x2e   :  { %v153_v48 = vrot.slane %v152_v40, 2  ;;  %v186_v49 = vmax.f32 %v184_v41, %v122_v4  ;;  %v145_v50 = vmax.f32 %v143_v34, %v144_v42  ;;  %v162_v51 = vrot.slane %v161_v43, 2 }
  0x2f   :  { %v171_v52 = vrot.slane %v170_v44, 2  ;;  %v179_v53 = vmax.f32 %v177_v37, %v178_v45  ;;  %v128_v54 = vrot.slane %v127_v46, 1  ;;  %v137_v55 = vrot.slane %v136_v47, 1 }
  0x30   :  { %v154_v56 = vmax.f32 %v152_v40, %v153_v48  ;;  %v187_v57 = vrot.slane %v186_v49, 4  ;;  %v146_v58 = vrot.slane %v145_v50, 1  ;;  %v163_v59 = vmax.f32 %v161_v43, %v162_v51 }
  0x31   :  { %v172_v60 = vmax.f32 %v170_v44, %v171_v52  ;;  %v180_v61 = vrot.slane %v179_v53, 2  ;;  %v129_v62 = vmax.f32 %v127_v46, %v128_v54  ;;  %v138_v63 = vmax.f32 %v136_v47, %v137_v55 }
  0x32   :  { %v155_v0 = vrot.slane %v154_v56, 1  ;;  %v188_v2 = vmax.f32 %v186_v49, %v187_v57  ;;  %v147_v3 = vmax.f32 %v145_v50, %v146_v58  ;;  %v164_v5 = vrot.slane %v163_v59, 1 }
  0x33   :  { %v173_v6 = vrot.slane %v172_v60, 1  ;;  %v181_v4 = vmax.f32 %v179_v53, %v180_v61  ;;  %v331_v7 = vpop.eup %330  ;;  %v202_v10 = vsel %vm201_vm1, %v138_v63, %v129_v62  ;;  %vm205_vm3 = vcmask 1043459  }
  0x34   :  { %v156_v8 = vmax.f32 %v154_v56, %v155_v0  ;;  %v189_v9 = vrot.slane %v188_v2, 2  ;;  %v242_v11 = vadd.f32 1.0, %v331_v7  ;;  %v165_v12 = vmax.f32 %v163_v59, %v164_v5 }
  0x35   :  { %vm207_vm4 = vcmask 1044484   ;;  %vm209_vm5 = vcmask 1045509   ;;  %v174_v13 = vmax.f32 %v172_v60, %v173_v6  ;;  %v182_v14 = vrot.slane %v181_v4, 1 }
  0x36   :  { %v190_v15 = vmax.f32 %v188_v2, %v189_v9  ;;  %v204_v16 = vsel %vm203_vm2, %v147_v3, %v202_v10  ;;  %v90_v17 = vlaneseq  ;;  %332 = vlog2.f32 %v242_v11 }
  0x37   :  { %v206_v18 = vsel %vm205_vm3, %v156_v8, %v204_v16  ;;  %vm211_vm6 = vcmask 1046534   ;;  %v245_v19 = vmul.f32 -0.5, %v331_v7  ;;  %v183_v20 = vmax.f32 %v181_v4, %v182_v14 }
  0x38   :  { %v191_v21 = vrot.slane %v190_v15, 1  ;;  %v208_v22 = vsel %vm207_vm4, %v165_v12, %v206_v18  ;;  %vm213_vm7 = vcmask 1047559   ;;  %v91_v28 = vshrl.u32 %v90_v17, 7 }
  0x39   :  { %v210_v23 = vsel %vm209_vm5, %v174_v13, %v208_v22  ;;  %v228_v29 = vand.u32 127, %v90_v17  ;;  %v246_v30 = vadd.f32 1.0, %v245_v19  ;;  %v235_v32 = vmax.f32 %v437_v1, 0.0 }
  0x3a   :  { %v192_v26 = vmax.f32 %v190_v15, %v191_v21  ;;  %v212_v27 = vsel %vm211_vm6, %v183_v20, %v210_v23  ;;  %v236_v33 = vmul.f32 %v222_v24, %v437_v1  ;;  %v248_v34 = vand.u32 2147483647, %v331_v7 }
  0x3b   :  { %v247_v36 = vmul.f32 %v331_v7, %v246_v30  ;;  %vm232_vm8 = vcmp.lt.s32.totalorder %v91_v28, 2  ;;  %vm233_vm9 = vcmp.lt.s32.totalorder %v228_v29, 16 }
  0x3c   :  { %v214_v31 = vsel %vm213_vm7, %v192_v26, %v212_v27  ;;  %v237_v38 = vsub.f32 %v235_v32, %v236_v33  ;;  %vm249_vm10 = vcmp.lt.f32.partialorder %v248_v34, 0.0004427343  ;;  %vm457_vm11 = vmand %vm232_vm8, %vm233_vm9 }
  0x3d   :  { %v216_v35 = vmax.f32 %v119_v25, %v214_v31 }
  0x3f   :  { %217 = vst.msk [vmem:[#allocation2] sm:$0xff] %vm72_vm0, %v216_v35 }
  0x40   :  { %v333_v37 = vpop.eup %332 }
  0x41   :  { %v244_v39 = vmul.f32 0.6931472, %v333_v37 }
  0x43   :  { %v250_v41 = vsel %vm249_vm10, %v247_v36, %v244_v39 }
  0x44   :  { %v251_v42 = vadd.f32 %v250_v41, %v237_v38 }
  0x46   :  { %v223_v43 = vld [vmem:[#allocation2] sm:$0xff]  ;;  %v252_v1 = vsel %vm457_vm11, %v251_v42, 0.0 }
  0x47   :  { %v256_v44 = vand.u32 2147483647, %v223_v43  ;;  %v271_v45 = vsel %vm72_vm0, %v252_v1, 0.0  ;;  %v253_v52 = vmax.f32 %v223_v43, 0.0  ;;  %v254_v53 = vmul.f32 %v223_v43, %v222_v24 }
  0x48   :  { %272 = vadd.xlane.f32.xlu0 %v271_v45 }
  0x49   :  { %v257_v46 = vsub.f32 0.0, %v256_v44  ;;  %v255_v57 = vsub.f32 %v253_v52, %v254_v53 }
  0x4b   :  { %v258_v47 = vmul.f32 1.442695, %v257_v46 }
  0x4d   :  { %334 = vpow2.f32 %v258_v47 }
  0x57   :  { %v335_v48 = vpop.eup %334 }
  0x58   :  { %v260_v49 = vadd.f32 1.0, %v335_v48  ;;  %v263_v50 = vmul.f32 -0.5, %v335_v48  ;;  %v266_v54 = vand.u32 2147483647, %v335_v48 }
  0x5a   :  { %336 = vlog2.f32 %v260_v49  ;;  %v264_v51 = vadd.f32 1.0, %v263_v50  ;;  %vm267_vm12 = vcmp.lt.f32.partialorder %v266_v54, 0.0004427343 }
  0x5c   :  { %v265_v55 = vmul.f32 %v335_v48, %v264_v51 }
  0x64   :  { %v337_v56 = vpop.eup %336 }
  0x65   :  { %v262_v58 = vmul.f32 0.6931472, %v337_v56 }
  0x67   :  { %v268_v59 = vsel %vm267_vm12, %v265_v55, %v262_v58 }
  0x68   :  { %v269_v60 = vadd.f32 %v268_v59, %v255_v57 }
  0x6a   :  { %v270_v61 = vsel %vm457_vm11, %v269_v60, 0.0 }
  0x6b   :  { %v281_v62 = vsel %vm72_vm0, %v270_v61, 0.0 }
  0x6c   :  { %282 = vadd.xlane.f32.xlu0 %v281_v62 }
  0xd5   :  { %v273_v63 = vpop.xlane.xlu0 %272 }
  0xd6   :  { %v274_v0 = vrot.slane %v273_v63, 4 }
  0xd8   :  { %v275_v2 = vadd.f32 %v274_v0, %v273_v63 }
  0xda   :  { %v276_v3 = vrot.slane %v275_v2, 2 }
  0xdc   :  { %v277_v5 = vadd.f32 %v276_v3, %v275_v2 }
  0xde   :  { %v278_v6 = vrot.slane %v277_v5, 1 }
  0xe0   :  { %v279_v4 = vadd.f32 %v278_v6, %v277_v5 }
  0xe2   :  { %313 = vpush %v279_v4 }
  0xf9   :  { %v283_v7 = vpop.xlane.xlu0 %282 }
  0xfa   :  { %v284_v8 = vrot.slane %v283_v7, 4 }
  0xfc   :  { %v285_v9 = vadd.f32 %v284_v8, %v283_v7 }
  0xfe   :  { %v286_v10 = vrot.slane %v285_v9, 2 }
 0x100   :  { %v287_v11 = vadd.f32 %v286_v10, %v285_v9 }
 0x102   :  { %v288_v12 = vrot.slane %v287_v11, 1 }
 0x104   :  { %v289_v13 = vadd.f32 %v288_v12, %v287_v11 }
 0x106   :  { %315 = vpush %v289_v13 }
 0x113   :  { %s314_s1 = spop %313 }
 0x137   :  { %s316_s13 = spop %315 }
 0x138   :  { %s291_s14 = sadd.f32 %s316_s13, %s314_s1 }
 0x13a   :  { %s292_s17 = smul.f32 0.03125, %s291_s14 }
 0x13c   :  { %v293_v14 = vstv %s292_s17 }
 0x13d   :  { %294 = vst [vmem:[#allocation8] sm:$0xff] %v293_v14 }
 0x13e   :  { %371 = shalt.err (!%p368_p12)
}
 0x13f   :  { %s372_s21 = scalar_lea.hbm %s482_s3, 128 }
 0x140   :  { %p373_p13 = scmp.ne.s32.totalorder %s482_s3, %s372_s21  ;;  %p376_p0 = scmp.lt.u32.totalorder %s372_s21, %s482_s3 }
 0x142   :  { %p378_p1 = pnand %p376_p0, %p373_p13 }
 0x144   :  { %381 = shalt.err (!%p378_p1)
}
 0x145   :  { %304 = dma.vmem_to_hbm [thread:$0]  %s302_s16, 128, %s482_s3, [#allocation5]  }
 0x146   :  { %386 = dma.done.wait [#allocation5], 128  }
 0x147   :  { %387 = vsyncadd [#allocation5], 4294967168 }
 0x148   :  { %308 = vsyncpa [#allocation4], 1 }
 0x149   :  { %309 = vsyncpa [#allocation7], 1 }
 0x14a   :  { %310 = vsyncpa [#allocation5], 1 }

</bundles_post_ra>
